<compile_context>
chip_gen: v5e
topology: v5e:2x2
jax: 0.10.0
libtpu: 0.0.40
codegen_flags: <defaults>
</compile_context>

<pallas_src>
import jax
import jax.numpy as jnp
from jax.experimental import pallas as pl
from jax.experimental.pallas import tpu as pltpu


_SUBLANE = 8
_LANE = 128


def _round_up(x, m):
    return ((x + m - 1) // m) * m


def _energies_kernel(hw_ref, enc_ref, out_ref):
    """One L tile of raw attention energies.

    enc block: (l_tile, B, H), native (L, B, H) layout (no wrapper pad /
    transpose of the big tensor).  hw: (B, H) f32.  out block: (B, l_tile) f32,
    lane-dense (L on the 128-lane axis).
    """
    enc = enc_ref[...].astype(jnp.float32)            # (l_tile, B, H)
    hw = hw_ref[...]                                   # (B, H) f32

    # VPU multiply + reduce over H.  For H ~= 128 this is an XLU lane-reduce
    # (can cap below HBM roofline on v6e/v7x); for the common H >= 512 the
    # cross-lane-group VPU adds dominate and it is effectively free.
    e = jnp.sum(enc * hw[None, :, :], axis=-1)         # (l_tile, B) f32

    # Tiny transpose of the *reduced* tile so the store is lane-dense
    # (B on sublanes, L on lanes).  enc is H x larger, so this XLU work is
    # negligible, and it deletes the wrapper-side energies transpose.
    out_ref[...] = e.T                                  # (B, l_tile)


def _log_softmax_kernel(e_ref, o_ref):
    """log_softmax over L (the lane axis) on the small (B, L) energies."""
    e = e_ref[...]                                      # (B, L) f32
    m = jnp.max(e, axis=-1, keepdims=True)              # (B, 1)
    s = jnp.sum(jnp.exp(e - m), axis=-1, keepdims=True)
    o_ref[...] = e - (m + jnp.log(s))


def attn_forward(hidden, encoder_outputs, weight, bias=None, *, max_tile_rows=None):
    """hidden: (1, B, H); encoder_outputs: (L, B, H); weight: (H, H); bias: (H,).

    Returns log-softmax attention energies of shape (B, 1, L).

    `bias` is accepted for interface parity but unused: it only shifts every
    energy of a row by the same constant, which log_softmax over L cancels.
    `max_tile_rows` optionally caps the L tile (used to exercise the
    multi-tile / ragged-last-tile path on small inputs).
    """
    del bias
    L, B, H = encoder_outputs.shape

    # hW[b, h] = sum_k hidden[0, b, k] * W[k, h]  -- one tiny XLA matmul,
    # hoisted out of the kernel (this is a one-time matmul, not per-element
    # pre-scaling).
    hw = jnp.dot(hidden[0].astype(jnp.float32), weight.astype(jnp.float32),
                 preferred_element_type=jnp.float32)           # (B, H) f32

    # ---- per-generation VMEM budget -> L tile selection ---------------------
    itemsize = jnp.dtype(encoder_outputs.dtype).itemsize
    row_bytes_in = _round_up(B, _SUBLANE) * _round_up(H, _LANE) * itemsize
    row_bytes_f32 = _round_up(B, _SUBLANE) * _round_up(H, _LANE) * 4

    try:
        vmem_cap = int(pltpu.get_tpu_info().vmem_capacity_bytes)
    except Exception:
        vmem_cap = 64 << 20          # v7x-safe fallback

    stream_budget = vmem_cap // 4    # enc double-buffer + in-body f32 temps
    # 2 DMA buffers of the enc tile + ~2 tile-sized f32 temporaries in the body.
    per_row = 2 * row_bytes_in + 2 * row_bytes_f32
    max_rows = max(stream_budget // per_row, _SUBLANE)
    if max_tile_rows is not None:
        max_rows = min(max_rows, max_tile_rows)

    if L <= max_rows:
        l_tile = L                                   # single tile; full-dim block
    else:
        # Output block's lane dim must be a multiple of 128 (or == L); the last
        # (possibly partial) block is handled by Pallas, no wrapper pad needed.
        l_tile = max((max_rows // _LANE) * _LANE, _LANE)
    n_tiles = pl.cdiv(L, l_tile)

    vmem_needed = (
        2 * l_tile * row_bytes_in                                    # enc dbuf
        + 2 * l_tile * row_bytes_f32                                 # body temps
        + 2 * _round_up(B, _SUBLANE) * _round_up(H, _LANE) * 4       # hW
        + 2 * _round_up(B, _SUBLANE) * _round_up(l_tile, _LANE) * 4  # out dbuf
    )
    # Leave headroom: never request more than 7/8 of physical VMEM per core.
    vmem_limit = max(16 << 20, min(int(vmem_needed + (4 << 20)),
                                   (vmem_cap * 7) // 8))

    # ---- kernel 1: streaming energies, tiled + parallel over L --------------
    energies = pl.pallas_call(
        _energies_kernel,
        out_shape=jax.ShapeDtypeStruct((B, L), jnp.float32),
        grid=(n_tiles,),
        in_specs=[
            pl.BlockSpec((B, H), lambda il: (0, 0)),                 # hW (const)
            pl.BlockSpec((l_tile, B, H), lambda il: (il, 0, 0)),     # enc, native
        ],
        out_specs=pl.BlockSpec((B, l_tile), lambda il: (0, il)),     # lane-dense
        compiler_params=pltpu.CompilerParams(
            dimension_semantics=("parallel",),   # independent tiles -> both v7x TCs
            vmem_limit_bytes=int(vmem_limit),
        ),
    )(hw, encoder_outputs)

    # ---- kernel 2: log-softmax finalize on the small (B, L) energies --------
    # TODO(synk): for extremely long L (where (B, L) no longer fits VMEM), tile
    # this over B or use an online two-pass; unnecessary at realistic sizes.
    logp = pl.pallas_call(
        _log_softmax_kernel,
        out_shape=jax.ShapeDtypeStruct((B, L), jnp.float32),
    )(energies)

    return logp[:, None, :]                                           # (B, 1, L)


def attn_ref(hidden, encoder_outputs, weight, bias):
    """Pure-JAX reference of the same forward pass (bias included)."""
    t = jnp.einsum("lbh,kh->lbk", encoder_outputs, weight) + bias     # nn.Linear
    energies = jnp.einsum("lbk,bk->bl", t, hidden[0])                 # (B, L)
    return jax.nn.log_softmax(energies, axis=-1)[:, None, :]


def _run_case(B, L, H, key, max_tile_rows=None):
    k1, k2, k3, k4 = jax.random.split(key, 4)
    hidden = jax.random.normal(k1, (1, B, H), dtype=jnp.float32)
    encoder_outputs = jax.random.normal(k2, (L, B, H), dtype=jnp.float32)
    bound = 1.0 / (H ** 0.5)                       # nn.Linear-style init
    weight = jax.random.uniform(k3, (H, H), jnp.float32, -bound, bound)
    bias = jax.random.uniform(k4, (H,), jnp.float32, -bound, bound)

    out = attn_forward(hidden, encoder_outputs, weight, bias,
                       max_tile_rows=max_tile_rows)
    out = jax.block_until_ready(out)
    ref = attn_ref(hidden, encoder_outputs, weight, bias)
    assert out.shape == (B, 1, L), out.shape
    assert jnp.allclose(out, ref, atol=1e-5, rtol=1e-5), "mismatch vs reference"


if __name__ == "__main__":
    key = jax.random.PRNGKey(0)
    k_small, k_ragged = jax.random.split(key)

    # Module-scale shapes: batch=2, seq(max_len)=8, hidden=32 (single tile).
    _run_case(B=2, L=8, H=32, key=k_small)

    # Multi-tile + ragged last tile (300 = 2*128 + 44) to exercise the
    # pad-free partial-block path.
    _run_case(B=2, L=300, H=32, key=k_ragged, max_tile_rows=128)

    print("KERNEL_OK")
</pallas_src>

<mosaic_0001>
module attributes {stable_mosaic.version = 11 : i64} {
  func.func @_energies_kernel(%arg0: i32, %arg1: memref<2x32xf32, #tpu.memory_space<vmem>>, %arg2: memref<8x2x32xf32, #tpu.memory_space<vmem>>, %arg3: memref<2x8xf32, #tpu.memory_space<vmem>>) attributes {dimension_semantics = [#tpu.dimension_semantics<parallel>], iteration_bounds = array<i64: 1>, scalar_prefetch = 0 : i64, scratch_operands = 0 : i64, tpu.core_type = #tpu.core_type<tc>, window_params = [{pipeline_mode = #tpu.pipeline_mode<synchronous>, transform_indices = @transform_0, window_bounds = array<i64: 2, 32>}, {transform_indices = @transform_1, window_bounds = array<i64: 8, 2, 32>}, {transform_indices = @transform_2, window_bounds = array<i64: 2, 8>}]} {
    %c0 = arith.constant 0 : index
    %c0_0 = arith.constant 0 : index
    %c0_1 = arith.constant 0 : index
    %0 = vector.load %arg2[%c0, %c0_0, %c0_1] : memref<8x2x32xf32, #tpu.memory_space<vmem>>, vector<8x2x32xf32>
    %c0_2 = arith.constant 0 : index
    %c0_3 = arith.constant 0 : index
    %1 = vector.load %arg1[%c0_2, %c0_3] : memref<2x32xf32, #tpu.memory_space<vmem>>, vector<2x32xf32>
    %2 = vector.shape_cast %1 : vector<2x32xf32> to vector<1x2x32xf32>
    %3 = vector.broadcast %2 : vector<1x2x32xf32> to vector<8x2x32xf32>
    %4 = arith.mulf %0, %3 : vector<8x2x32xf32>
    %cst = arith.constant dense<0.000000e+00> : vector<8x2xf32>
    %5 = vector.multi_reduction <add>, %4, %cst [2] : vector<8x2x32xf32> to vector<8x2xf32>
    %6 = tpu.transpose %5, [1, 0] : vector<8x2xf32> -> vector<2x8xf32>
    %c0_4 = arith.constant 0 : index
    %c0_5 = arith.constant 0 : index
    %7 = vector.load %arg3[%c0_4, %c0_5] : memref<2x8xf32, #tpu.memory_space<vmem>>, vector<2x8xf32>
    tpu.vector_store %arg3[%c0_4, %c0_5], %6 {strides = array<i32>} : memref<2x8xf32, #tpu.memory_space<vmem>>, vector<2x8xf32>,
    return
  }
  func.func @transform_0(%arg0: i32) -> (i32, i32) {
    %c0_i32 = arith.constant 0 : i32
    %c0_i32_0 = arith.constant 0 : i32
    %c0_i32_1 = arith.constant 0 : i32
    return %c0_i32, %c0_i32_0 : i32, i32
  }
  func.func @transform_1(%arg0: i32) -> (i32, i32, i32) {
    %c0_i32 = arith.constant 0 : i32
    %c0_i32_0 = arith.constant 0 : i32
    %c0_i32_1 = arith.constant 0 : i32
    return %arg0, %c0_i32, %c0_i32_0 : i32, i32, i32
  }
  func.func @transform_2(%arg0: i32) -> (i32, i32) {
    %c0_i32 = arith.constant 0 : i32
    %c0_i32_0 = arith.constant 0 : i32
    return %c0_i32, %arg0 : i32, i32
  }
}

</mosaic_0001>

<bundles_post_ra>
// kernel: tpu_custom_call.1
= control target key start
LH: loop header
LB: loop body
LE: loop exit
PB: predicated region body
PF: predicated region fallthrough
CT: control target
= control target key end

     0   :  { %7 = vsyncpa [#allocation3], 0  ;;  %s290_s0 = inlined_call_operand.hbm [shape: f32[2,32], index: 0, kind: input, shape index: {}]   ;;  %s291_s1 = inlined_call_operand.hbm [shape: f32[8,2,32], index: 1, kind: input, shape index: {}]   ;;  %s292_s2 = inlined_call_operand.hbm [shape: f32[2,8], index: 2, kind: output, shape index: {}]  }
   0x1   :  { %8 = vsyncpa [#allocation6], 0 }
   0x2   :  { %9 = vsyncpa [#allocation4], 0  ;;  %s15_s11 = sshll.u32 %s290_s0, 4  ;;  %s253_s12 = smov [#allocation2]   ;;  %s16_s11 = int_to_ptr.hbm [resolvable:$true] %s15_s11 }
   0x3   :  { %s17_s13 = sshll.u32 %s253_s12, 4  ;;  %s25_s16 = sshll.u32 %s291_s1, 4  ;;  %s18_s13 = int_to_ptr.vmem [resolvable:$true] %s17_s13  ;;  %s26_s16 = int_to_ptr.hbm [resolvable:$true] %s25_s16 }
   0x4   :  { %20 = dma.hbm_to_vmem [thread:$0]  %s16_s11, 32, %s18_s13, [#allocation3]  }
   0x5   :  { %s254_s17 = smov [#allocation5]   ;;  %s255_s19 = smov 32  }
   0x6   :  { %s27_s18 = sshll.u32 %s254_s17, 4  ;;  %s256_s20 = smov 2   ;;  %s28_s18 = int_to_ptr.vmem [resolvable:$true] %s27_s18 }
   0x7   :  { %33 = dma.hbm_to_vmem [thread:$0]  %s26_s16, 256, %s28_s18, [#allocation6], %s255_s19, %s255_s19, %s256_s20  }
   0x8   :  { %247 = dma.done.wait [#allocation3], 32  }
   0x9   :  { %248 = vsyncadd [#allocation3], 4294967264 }
   0xa   :  { %249 = dma.done.wait [#allocation6], 256  }
   0xb   :  { %250 = vsyncadd [#allocation6], 4294967040  ;;  %vm59_vm0 = vcmask 254976   ;;  %v42_v0 = vld [vmem:[#allocation5] sm:$0x3]  ;;  %v92_v27 = vlaneseq  ;;  %vm102_vm1 = vcmask 1041409  }
   0xc   :  { %v50_v1 = vld [vmem:[#allocation2] sm:$0x3]  ;;  %v44_v2 = vld [vmem:[#allocation5 + $0x4] sm:$0x3]  ;;  %v46_v5 = vld [vmem:[#allocation5 + $0x8] sm:$0x3] }
   0xd   :  { %v51_v3 = vmul.f32 %v50_v1, %v42_v0  ;;  %v53_v4 = vmul.f32 %v50_v1, %v44_v2  ;;  %v55_v6 = vmul.f32 %v50_v1, %v46_v5  ;;  %v43_v7 = vld [vmem:[#allocation5 + $0x2] sm:$0x3]  ;;  %v45_v8 = vld [vmem:[#allocation5 + $0x6] sm:$0x3]  ;;  %v47_v11 = vld [vmem:[#allocation5 + $0xa] sm:$0x3] }
   0xe   :  { %v52_v13 = vmul.f32 %v50_v1, %v43_v7  ;;  %v54_v14 = vmul.f32 %v50_v1, %v45_v8  ;;  %v56_v15 = vmul.f32 %v50_v1, %v47_v11  ;;  %v48_v19 = vld [vmem:[#allocation5 + $0xc] sm:$0x3]  ;;  %v49_v20 = vld [vmem:[#allocation5 + $0xe] sm:$0x3]  ;;  %v93_v29 = vand.u32 127, %v92_v27  ;;  %s257_s0 = smov [#allocation7]  }
   0xf   :  { %v60_v9 = vsel %vm59_vm0, %v51_v3, 0.0  ;;  %v66_v10 = vsel %vm59_vm0, %v53_v4, 0.0  ;;  %v72_v12 = vsel %vm59_vm0, %v55_v6, 0.0  ;;  %v57_v21 = vmul.f32 %v50_v1, %v48_v19  ;;  %s156_s1 = sshll.u32 %s257_s0, 4  ;;  %s158_s23 = sshll.u32 %s292_s2, 4  ;;  %s157_s1 = int_to_ptr.vmem [resolvable:$true] %s156_s1  ;;  %s159_s23 = int_to_ptr.hbm [resolvable:$true] %s158_s23 }
  0x10   :  { %61 = vadd.xlane.f32.xlu0 %v60_v9  ;;  %67 = vadd.xlane.f32.xlu1 %v66_v10  ;;  %v63_v16 = vsel %vm59_vm0, %v52_v13, 0.0  ;;  %v69_v17 = vsel %vm59_vm0, %v54_v14, 0.0  ;;  %v75_v18 = vsel %vm59_vm0, %v56_v15, 0.0  ;;  %v58_v22 = vmul.f32 %v50_v1, %v49_v20 }
  0x11   :  { %73 = vadd.xlane.f32.xlu2 %v72_v12  ;;  %v78_v23 = vsel %vm59_vm0, %v57_v21, 0.0  ;;  %vm104_vm2 = vcmask 1042434   ;;  %vm106_vm3 = vcmask 1043459   ;;  %vm108_vm4 = vcmask 1044484  }
  0x12   :  { %v81_v24 = vsel %vm59_vm0, %v58_v22, 0.0  ;;  %vm110_vm5 = vcmask 1045509   ;;  %vm112_vm6 = vcmask 1046534   ;;  %vm114_vm7 = vcmask 1047559  }
  0x13   :  { %vm149_vm8 = vcmask 58368  }
  0x18   :  { %64 = vadd.xlane.f32.xlu0 %v63_v16  ;;  %70 = vadd.xlane.f32.xlu1 %v69_v17 }
  0x19   :  { %76 = vadd.xlane.f32.xlu2 %v75_v18 }
  0x20   :  { %79 = vadd.xlane.f32.xlu0 %v78_v23  ;;  %82 = vadd.xlane.f32.xlu1 %v81_v24 }
  0x83   :  { %v62_v25 = vpop.xlane.xlu0 %61  ;;  %v68_v26 = vpop.xlane.xlu1 %67 }
  0x84   :  { %v74_v28 = vpop.xlane.xlu2 %73  ;;  %v94_v32 = vperm.slane %v62_v25, %v93_v29  ;;  %v96_v35 = vperm.slane %v68_v26, %v93_v29 }
  0x85   :  { %v98_v39 = vperm.slane %v74_v28, %v93_v29 }
  0x8b   :  { %v65_v30 = vpop.xlane.xlu0 %64  ;;  %v71_v31 = vpop.xlane.xlu1 %70 }
  0x8c   :  { %v95_v33 = vperm.slane %v65_v30, %v93_v29  ;;  %v97_v34 = vperm.slane %v71_v31, %v93_v29  ;;  %v77_v37 = vpop.xlane.xlu2 %76 }
  0x8d   :  { %v99_v41 = vperm.slane %v77_v37, %v93_v29 }
  0x8e   :  { %v103_v36 = vsel %vm102_vm1, %v95_v33, %v94_v32 }
  0x8f   :  { %v105_v38 = vsel %vm104_vm2, %v96_v35, %v103_v36 }
  0x90   :  { %v107_v40 = vsel %vm106_vm3, %v97_v34, %v105_v38 }
  0x91   :  { %v109_v42 = vsel %vm108_vm4, %v98_v39, %v107_v40 }
  0x92   :  { %v111_v47 = vsel %vm110_vm5, %v99_v41, %v109_v42 }
  0x93   :  { %v80_v43 = vpop.xlane.xlu0 %79  ;;  %v83_v44 = vpop.xlane.xlu1 %82 }
  0x94   :  { %v100_v45 = vperm.slane %v80_v43, %v93_v29  ;;  %v101_v46 = vperm.slane %v83_v44, %v93_v29 }
  0x96   :  { %v113_v48 = vsel %vm112_vm6, %v100_v45, %v111_v47 }
  0x97   :  { %v115_v49 = vsel %vm114_vm7, %v101_v46, %v113_v48 }
  0x98   :  { %117 = vxpose.xlu2.b32.start.end [1/1] (short) (narrow) %v115_v49, 8 }
 0x131   :  { %v133_v50 = vpop.trf.xlu2 }
 0x132   :  { %150 = vst.msk [vmem:[#allocation7] sm:$0x3] %vm149_vm8, %v133_v50 }
 0x133   :  { %161 = dma.vmem_to_hbm [thread:$0]  %s157_s1, 32, %s159_s23, [#allocation4]  }
 0x134   :  { %251 = dma.done.wait [#allocation4], 32  }
 0x135   :  { %252 = vsyncadd [#allocation4], 4294967264 }
 0x136   :  { %166 = vsyncpa [#allocation3], 1 }
 0x137   :  { %167 = vsyncpa [#allocation6], 1 }
 0x138   :  { %168 = vsyncpa [#allocation4], 1 }

</bundles_post_ra>
